<compile_context>
chip_gen: v7x
topology: tpu7x:2x2x1
jax: 0.10.0
libtpu: 0.0.40
codegen_flags: <defaults>
</compile_context>

<pallas_src>
import jax
import jax.numpy as jnp
from jax import lax
from jax.experimental import pallas as pl
from jax.experimental.pallas import tpu as pltpu

LN_EPS = 1e-12


def _layer_norm(y, gamma, beta):
    mean = jnp.mean(y, axis=-1, keepdims=True)
    var = jnp.mean(jnp.square(y - mean), axis=-1, keepdims=True)
    return gamma * ((y - mean) * lax.rsqrt(var + LN_EPS)) + beta


def dcgcn_fused_kernel(x_tile_ref, x_row0_ref,
                       w_row_ref, b_row_ref, w_col_ref, b_col_ref,
                       gamma_ref, beta_ref,
                       mask_tile_ref, mask_row0_ref,
                       o_ref):
    f32 = jnp.float32
    xt = x_tile_ref[...].astype(f32)        # (tm, T, H)  tile of rows i0..i0+tm-1
    row0 = x_row0_ref[...].astype(f32)      # (T, H)      first-row side-channel
    tm, T, H = xt.shape
    num_layers = w_row_ref.shape[0]

    # Hoisted mask broadcasts, reused across all layers (pure lane broadcast;
    # the host already expanded the mask to (T, T, 1)).
    mask_tile = jnp.broadcast_to(mask_tile_ref[...].astype(f32), (tm, T, H))
    mask_row0 = jnp.broadcast_to(mask_row0_ref[...].astype(f32), (T, H))

    # Layer count is small and static -> unrolled Python loop (LLO sees it all).
    for l in range(num_layers):
        w_row = w_row_ref[l].astype(f32)    # (H, H), pre-transposed: x @ W
        b_row = b_row_ref[l].astype(f32)    # (1, H)
        w_col = w_col_ref[l].astype(f32)
        b_col = b_col_ref[l].astype(f32)
        gamma = gamma_ref[l].astype(f32)    # (1, H)
        beta = beta_ref[l].astype(f32)      # (1, H)

        # MXU projections.
        rp = jnp.dot(row0, w_row, preferred_element_type=f32) + b_row                    # (T, H)
        cp_tile = jnp.dot(xt[:, T - 1, :], w_col, preferred_element_type=f32) + b_col    # (tm, H)
        cp_row0 = jnp.dot(row0[T - 1:T, :], w_col, preferred_element_type=f32) + b_col   # (1, H)

        # Tile update: new[i, j] = relu(rp[j] + cp[i]); out = LN(new + x) * mask
        new_tile = jnp.maximum(rp[None, :, :] + cp_tile[:, None, :], 0.0)                # (tm, T, H)
        xt = _layer_norm(new_tile + xt, gamma, beta) * mask_tile

        # Row-0 side-channel update (what the next layer's rp needs).
        new_row0 = jnp.maximum(rp + cp_row0, 0.0)                                        # (T, H)
        row0 = _layer_norm(new_row0 + row0, gamma, beta) * mask_row0

    o_ref[...] = xt.astype(o_ref.dtype)


def dcgcn_forward(x, params, iou_mask_map, *, row_block=None):
    """Fused DCGCN forward. x: [B, T, T, H]; params: list of
    (w_row[out,in], b_row[H], w_col[out,in], b_col[H], gamma[H], beta[H])."""
    B, T, T2, H = x.shape
    assert T == T2
    L = len(params)
    if row_block is None:
        row_block = T
    assert T % row_block == 0, "row_block must divide T"
    n_row_tiles = T // row_block

    # Stack per-layer parameters; pre-transpose weights so the kernel does x @ W.
    w_row_all = jnp.stack([p[0].T for p in params])          # (L, H, H)
    b_row_all = jnp.stack([p[1][None, :] for p in params])   # (L, 1, H)
    w_col_all = jnp.stack([p[2].T for p in params])          # (L, H, H)
    b_col_all = jnp.stack([p[3][None, :] for p in params])   # (L, 1, H)
    gamma_all = jnp.stack([p[4][None, :] for p in params])   # (L, 1, H)
    beta_all = jnp.stack([p[5][None, :] for p in params])    # (L, 1, H)

    # Host-expanded mask: (T, T, 1) so no in-kernel cross-lane relayout.
    mask_e = iou_mask_map.astype(jnp.float32)[:, :, None]

    grid_spec = pltpu.PrefetchScalarGridSpec(
        num_scalar_prefetch=0,
        grid=(B, n_row_tiles),
        in_specs=[
            # x tile: rows [i*row_block, (i+1)*row_block), all columns.
            pl.BlockSpec((None, row_block, T, H), lambda b, i: (b, i, 0, 0)),
            # x first row (constant over the i-tile axis).
            pl.BlockSpec((None, None, T, H), lambda b, i: (b, 0, 0, 0)),
            # Stacked per-layer weights / biases / LN params (loaded once, reused).
            pl.BlockSpec((L, H, H), lambda b, i: (0, 0, 0)),
            pl.BlockSpec((L, 1, H), lambda b, i: (0, 0, 0)),
            pl.BlockSpec((L, H, H), lambda b, i: (0, 0, 0)),
            pl.BlockSpec((L, 1, H), lambda b, i: (0, 0, 0)),
            pl.BlockSpec((L, 1, H), lambda b, i: (0, 0, 0)),
            pl.BlockSpec((L, 1, H), lambda b, i: (0, 0, 0)),
            # Mask: tile rows, and row 0.
            pl.BlockSpec((row_block, T, 1), lambda b, i: (i, 0, 0)),
            pl.BlockSpec((None, T, 1), lambda b, i: (0, 0, 0)),
        ],
        out_specs=pl.BlockSpec((None, row_block, T, H), lambda b, i: (b, i, 0, 0)),
    )
    return pl.pallas_call(
        dcgcn_fused_kernel,
        out_shape=jax.ShapeDtypeStruct((B, T, T, H), x.dtype),
        grid_spec=grid_spec,
        compiler_params=pltpu.CompilerParams(
            dimension_semantics=("parallel", "parallel")),
    )(x, x, w_row_all, b_row_all, w_col_all, b_col_all, gamma_all, beta_all,
      mask_e, mask_e)


def dcgcn_reference(x, params, mask):
    # Pure-JAX reference mirroring the PyTorch forward.
    for (w_row, b_row, w_col, b_col, gamma, beta) in params:
        first_row = x[:, 0, :, :]                  # [B, T, H]
        last_col = x[:, :, -1, :]                  # [B, T, H]
        rp = first_row @ w_row.T + b_row           # [B, T, H]
        cp = last_col @ w_col.T + b_col            # [B, T, H]
        new = jax.nn.relu(rp[:, None, :, :] + cp[:, :, None, :])
        y = new + x
        mean = jnp.mean(y, axis=-1, keepdims=True)
        var = jnp.mean(jnp.square(y - mean), axis=-1, keepdims=True)
        y = (y - mean) * lax.rsqrt(var + LN_EPS)
        y = gamma * y + beta
        x = y * mask[None, :, :, None]
    return x


if __name__ == "__main__":
    # Small deterministic config.
    batch = 2
    num_clips = 7
    T = num_clips + 1            # 8
    hidden_size = 32
    H = 3 * hidden_size          # 96
    graph_layer_num = 2

    key = jax.random.PRNGKey(0)
    keys = jax.random.split(key, 1 + 4 * graph_layer_num)

    x = jax.random.normal(keys[0], (batch, T, T, H), dtype=jnp.float32)

    # iou_mask_map buffer: deterministic float mask [T, T] (upper-triangular style).
    ii = jnp.arange(T)[:, None]
    jj = jnp.arange(T)[None, :]
    iou_mask_map = (jj >= ii).astype(jnp.float32)

    params = []
    for l in range(graph_layer_num):
        k0, k1, k2, k3 = keys[1 + 4 * l: 1 + 4 * (l + 1)]
        w_row = 0.05 * jax.random.normal(k0, (H, H), dtype=jnp.float32)   # [out, in]
        b_row = 0.05 * jax.random.normal(k1, (H,), dtype=jnp.float32)
        w_col = 0.05 * jax.random.normal(k2, (H, H), dtype=jnp.float32)
        b_col = 0.05 * jax.random.normal(k3, (H,), dtype=jnp.float32)
        gamma = jnp.ones((H,), dtype=jnp.float32)
        beta = jnp.zeros((H,), dtype=jnp.float32)
        params.append((w_row, b_row, w_col, b_col, gamma, beta))

    # f32 path (strict check). row_block=4 exercises the i-tiled grid (2 tiles x 2 batches).
    out = jax.block_until_ready(dcgcn_forward(x, params, iou_mask_map, row_block=4))
    ref = jax.block_until_ready(dcgcn_reference(x, params, iou_mask_map))
    assert out.shape == (batch, T, T, H)
    assert jnp.allclose(out, ref, atol=1e-4, rtol=1e-4), "f32 mismatch vs reference"

    # bf16 storage path (halved HBM traffic; compute stays f32 inside the kernel).
    x_b = x.astype(jnp.bfloat16)
    params_b = [tuple(q.astype(jnp.bfloat16) for q in p) for p in params]
    out_b = jax.block_until_ready(dcgcn_forward(x_b, params_b, iou_mask_map, row_block=4))
    ref_b = dcgcn_reference(x_b.astype(jnp.float32),
                            [tuple(q.astype(jnp.float32) for q in p) for p in params_b],
                            iou_mask_map)
    ref_b = jax.block_until_ready(ref_b)
    assert out_b.dtype == jnp.bfloat16
    assert jnp.allclose(out_b.astype(jnp.float32), ref_b, atol=3e-2, rtol=3e-2), \
        "bf16 mismatch vs reference"

    print("KERNEL_OK")
</pallas_src>

<mosaic_0001>
module attributes {stable_mosaic.version = 11 : i64} {
  func.func @dcgcn_fused_kernel(%arg0: i32, %arg1: i32, %arg2: memref<1x4x8x96xf32, #tpu.memory_space<vmem>>, %arg3: memref<1x1x8x96xf32, #tpu.memory_space<vmem>>, %arg4: memref<2x96x96xf32, #tpu.memory_space<vmem>>, %arg5: memref<2x1x96xf32, #tpu.memory_space<vmem>>, %arg6: memref<2x96x96xf32, #tpu.memory_space<vmem>>, %arg7: memref<2x1x96xf32, #tpu.memory_space<vmem>>, %arg8: memref<2x1x96xf32, #tpu.memory_space<vmem>>, %arg9: memref<2x1x96xf32, #tpu.memory_space<vmem>>, %arg10: memref<4x8x1xf32, #tpu.memory_space<vmem>>, %arg11: memref<1x8x1xf32, #tpu.memory_space<vmem>>, %arg12: memref<1x4x8x96xf32, #tpu.memory_space<vmem>>) attributes {dimension_semantics = [#tpu.dimension_semantics<parallel>, #tpu.dimension_semantics<parallel>], iteration_bounds = array<i64: 2, 2>, scalar_prefetch = 0 : i64, scratch_operands = 0 : i64, tpu.core_type = #tpu.core_type<tc>, window_params = [{transform_indices = @transform_0, window_bounds = array<i64: 1, 4, 8, 96>}, {transform_indices = @transform_1, window_bounds = array<i64: 1, 1, 8, 96>}, {pipeline_mode = #tpu.pipeline_mode<synchronous>, transform_indices = @transform_2, window_bounds = array<i64: 2, 96, 96>}, {pipeline_mode = #tpu.pipeline_mode<synchronous>, transform_indices = @transform_3, window_bounds = array<i64: 2, 1, 96>}, {pipeline_mode = #tpu.pipeline_mode<synchronous>, transform_indices = @transform_4, window_bounds = array<i64: 2, 96, 96>}, {pipeline_mode = #tpu.pipeline_mode<synchronous>, transform_indices = @transform_5, window_bounds = array<i64: 2, 1, 96>}, {pipeline_mode = #tpu.pipeline_mode<synchronous>, transform_indices = @transform_6, window_bounds = array<i64: 2, 1, 96>}, {pipeline_mode = #tpu.pipeline_mode<synchronous>, transform_indices = @transform_7, window_bounds = array<i64: 2, 1, 96>}, {transform_indices = @transform_8, window_bounds = array<i64: 4, 8, 1>}, {transform_indices = @transform_9, window_bounds = array<i64: 1, 8, 1>}, {transform_indices = @transform_10, window_bounds = array<i64: 1, 4, 8, 96>}]} {
    %c0 = arith.constant 0 : index
    %c0_0 = arith.constant 0 : index
    %c0_1 = arith.constant 0 : index
    %c0_2 = arith.constant 0 : index
    %0 = vector.load %arg2[%c0, %c0_0, %c0_1, %c0_2] : memref<1x4x8x96xf32, #tpu.memory_space<vmem>>, vector<1x4x8x96xf32>
    %1 = vector.shape_cast %0 : vector<1x4x8x96xf32> to vector<4x8x96xf32>
    %c0_3 = arith.constant 0 : index
    %c0_4 = arith.constant 0 : index
    %c0_5 = arith.constant 0 : index
    %c0_6 = arith.constant 0 : index
    %2 = vector.load %arg3[%c0_3, %c0_4, %c0_5, %c0_6] : memref<1x1x8x96xf32, #tpu.memory_space<vmem>>, vector<1x1x8x96xf32>
    %3 = vector.shape_cast %2 : vector<1x1x8x96xf32> to vector<8x96xf32>
    %c0_7 = arith.constant 0 : index
    %c0_8 = arith.constant 0 : index
    %c0_9 = arith.constant 0 : index
    %4 = vector.load %arg10[%c0_7, %c0_8, %c0_9] : memref<4x8x1xf32, #tpu.memory_space<vmem>>, vector<4x8x1xf32>
    %5 = vector.shape_cast %4 : vector<4x8x1xf32> to vector<4x8x1xf32>
    %6 = vector.broadcast %5 : vector<4x8x1xf32> to vector<4x8x96xf32>
    %c0_10 = arith.constant 0 : index
    %c0_11 = arith.constant 0 : index
    %c0_12 = arith.constant 0 : index
    %7 = vector.load %arg11[%c0_10, %c0_11, %c0_12] : memref<1x8x1xf32, #tpu.memory_space<vmem>>, vector<1x8x1xf32>
    %8 = vector.shape_cast %7 : vector<1x8x1xf32> to vector<8x1xf32>
    %9 = vector.shape_cast %8 : vector<8x1xf32> to vector<8x1xf32>
    %10 = vector.broadcast %9 : vector<8x1xf32> to vector<8x96xf32>
    %c0_13 = arith.constant 0 : index
    %c0_14 = arith.constant 0 : index
    %c0_15 = arith.constant 0 : index
    %11 = vector.load %arg4[%c0_13, %c0_14, %c0_15] : memref<2x96x96xf32, #tpu.memory_space<vmem>>, vector<1x96x96xf32>
    %12 = vector.shape_cast %11 : vector<1x96x96xf32> to vector<96x96xf32>
    %c0_16 = arith.constant 0 : index
    %c0_17 = arith.constant 0 : index
    %c0_18 = arith.constant 0 : index
    %13 = vector.load %arg5[%c0_16, %c0_17, %c0_18] : memref<2x1x96xf32, #tpu.memory_space<vmem>>, vector<1x1x96xf32>
    %14 = vector.shape_cast %13 : vector<1x1x96xf32> to vector<1x96xf32>
    %c0_19 = arith.constant 0 : index
    %c0_20 = arith.constant 0 : index
    %c0_21 = arith.constant 0 : index
    %15 = vector.load %arg6[%c0_19, %c0_20, %c0_21] : memref<2x96x96xf32, #tpu.memory_space<vmem>>, vector<1x96x96xf32>
    %16 = vector.shape_cast %15 : vector<1x96x96xf32> to vector<96x96xf32>
    %c0_22 = arith.constant 0 : index
    %c0_23 = arith.constant 0 : index
    %c0_24 = arith.constant 0 : index
    %17 = vector.load %arg7[%c0_22, %c0_23, %c0_24] : memref<2x1x96xf32, #tpu.memory_space<vmem>>, vector<1x1x96xf32>
    %18 = vector.shape_cast %17 : vector<1x1x96xf32> to vector<1x96xf32>
    %c0_25 = arith.constant 0 : index
    %c0_26 = arith.constant 0 : index
    %c0_27 = arith.constant 0 : index
    %19 = vector.load %arg8[%c0_25, %c0_26, %c0_27] : memref<2x1x96xf32, #tpu.memory_space<vmem>>, vector<1x1x96xf32>
    %20 = vector.shape_cast %19 : vector<1x1x96xf32> to vector<1x96xf32>
    %c0_28 = arith.constant 0 : index
    %c0_29 = arith.constant 0 : index
    %c0_30 = arith.constant 0 : index
    %21 = vector.load %arg9[%c0_28, %c0_29, %c0_30] : memref<2x1x96xf32, #tpu.memory_space<vmem>>, vector<1x1x96xf32>
    %22 = vector.shape_cast %21 : vector<1x1x96xf32> to vector<1x96xf32>
    %cst = arith.constant dense<0.000000e+00> : vector<8x96xf32>
    %23 = tpu.matmul %3, %12, %cst {dimension_numbers = #tpu.dot_dimension_numbers<[1], [0], [0], [1], [0, 0, 1, 1], [], []>} : vector<8x96xf32>, vector<96x96xf32>, vector<8x96xf32> -> vector<8x96xf32>
    %24 = vector.broadcast %14 : vector<1x96xf32> to vector<8x96xf32>
    %25 = arith.addf %23, %24 : vector<8x96xf32>
    %26 = vector.extract_strided_slice %1 {offsets = [0, 7, 0], sizes = [4, 1, 96], strides = [1, 1, 1]} : vector<4x8x96xf32> to vector<4x1x96xf32>
    %27 = vector.shape_cast %26 : vector<4x1x96xf32> to vector<4x96xf32>
    %cst_31 = arith.constant dense<0.000000e+00> : vector<4x96xf32>
    %28 = tpu.matmul %27, %16, %cst_31 {dimension_numbers = #tpu.dot_dimension_numbers<[1], [0], [0], [1], [0, 0, 1, 1], [], []>} : vector<4x96xf32>, vector<96x96xf32>, vector<4x96xf32> -> vector<4x96xf32>
    %29 = vector.broadcast %18 : vector<1x96xf32> to vector<4x96xf32>
    %30 = arith.addf %28, %29 : vector<4x96xf32>
    %31 = vector.extract_strided_slice %3 {offsets = [7, 0], sizes = [1, 96], strides = [1, 1]} : vector<8x96xf32> to vector<1x96xf32>
    %cst_32 = arith.constant dense<0.000000e+00> : vector<1x96xf32>
    %32 = tpu.matmul %31, %16, %cst_32 {dimension_numbers = #tpu.dot_dimension_numbers<[1], [0], [0], [1], [0, 0, 1, 1], [], []>} : vector<1x96xf32>, vector<96x96xf32>, vector<1x96xf32> -> vector<1x96xf32>
    %33 = arith.addf %32, %18 : vector<1x96xf32>
    %34 = vector.shape_cast %25 : vector<8x96xf32> to vector<1x8x96xf32>
    %35 = vector.shape_cast %30 : vector<4x96xf32> to vector<4x1x96xf32>
    %36 = vector.broadcast %34 : vector<1x8x96xf32> to vector<4x8x96xf32>
    %37 = vector.broadcast %35 : vector<4x1x96xf32> to vector<4x8x96xf32>
    %38 = arith.addf %36, %37 : vector<4x8x96xf32>
    %cst_33 = arith.constant 0.000000e+00 : f32
    %39 = vector.broadcast %cst_33 : f32 to vector<4x8x96xf32>
    %40 = arith.maximumf %38, %39 : vector<4x8x96xf32>
    %41 = arith.addf %40, %1 : vector<4x8x96xf32>
    %cst_34 = arith.constant dense<0.000000e+00> : vector<4x8xf32>
    %42 = vector.multi_reduction <add>, %41, %cst_34 [2] : vector<4x8x96xf32> to vector<4x8xf32>
    %43 = vector.shape_cast %42 : vector<4x8xf32> to vector<4x8x1xf32>
    %cst_35 = arith.constant 9.600000e+01 : f32
    %44 = vector.broadcast %cst_35 : f32 to vector<4x8x1xf32>
    %45 = arith.divf %43, %44 : vector<4x8x1xf32>
    %46 = vector.broadcast %45 : vector<4x8x1xf32> to vector<4x8x96xf32>
    %47 = arith.subf %41, %46 : vector<4x8x96xf32>
    %48 = arith.mulf %47, %47 : vector<4x8x96xf32>
    %cst_36 = arith.constant dense<0.000000e+00> : vector<4x8xf32>
    %49 = vector.multi_reduction <add>, %48, %cst_36 [2] : vector<4x8x96xf32> to vector<4x8xf32>
    %50 = vector.shape_cast %49 : vector<4x8xf32> to vector<4x8x1xf32>
    %cst_37 = arith.constant 9.600000e+01 : f32
    %51 = vector.broadcast %cst_37 : f32 to vector<4x8x1xf32>
    %52 = arith.divf %50, %51 : vector<4x8x1xf32>
    %53 = vector.broadcast %45 : vector<4x8x1xf32> to vector<4x8x96xf32>
    %54 = arith.subf %41, %53 : vector<4x8x96xf32>
    %cst_38 = arith.constant 9.99999996E-13 : f32
    %55 = vector.broadcast %cst_38 : f32 to vector<4x8x1xf32>
    %56 = arith.addf %52, %55 : vector<4x8x1xf32>
    %57 = math.rsqrt %56 : vector<4x8x1xf32>
    %58 = vector.broadcast %57 : vector<4x8x1xf32> to vector<4x8x96xf32>
    %59 = arith.mulf %54, %58 : vector<4x8x96xf32>
    %60 = vector.shape_cast %20 : vector<1x96xf32> to vector<1x1x96xf32>
    %61 = vector.broadcast %60 : vector<1x1x96xf32> to vector<4x8x96xf32>
    %62 = arith.mulf %61, %59 : vector<4x8x96xf32>
    %63 = vector.shape_cast %22 : vector<1x96xf32> to vector<1x1x96xf32>
    %64 = vector.broadcast %63 : vector<1x1x96xf32> to vector<4x8x96xf32>
    %65 = arith.addf %62, %64 : vector<4x8x96xf32>
    %66 = arith.mulf %65, %6 : vector<4x8x96xf32>
    %67 = vector.broadcast %33 : vector<1x96xf32> to vector<8x96xf32>
    %68 = arith.addf %25, %67 : vector<8x96xf32>
    %cst_39 = arith.constant 0.000000e+00 : f32
    %69 = vector.broadcast %cst_39 : f32 to vector<8x96xf32>
    %70 = arith.maximumf %68, %69 : vector<8x96xf32>
    %71 = arith.addf %70, %3 : vector<8x96xf32>
    %cst_40 = arith.constant dense<0.000000e+00> : vector<8xf32>
    %72 = vector.multi_reduction <add>, %71, %cst_40 [1] : vector<8x96xf32> to vector<8xf32>
    %73 = vector.shape_cast %72 : vector<8xf32> to vector<8x1xf32>
    %cst_41 = arith.constant 9.600000e+01 : f32
    %74 = vector.broadcast %cst_41 : f32 to vector<8x1xf32>
    %75 = arith.divf %73, %74 : vector<8x1xf32>
    %76 = vector.broadcast %75 : vector<8x1xf32> to vector<8x96xf32>
    %77 = arith.subf %71, %76 : vector<8x96xf32>
    %78 = arith.mulf %77, %77 : vector<8x96xf32>
    %cst_42 = arith.constant dense<0.000000e+00> : vector<8xf32>
    %79 = vector.multi_reduction <add>, %78, %cst_42 [1] : vector<8x96xf32> to vector<8xf32>
    %80 = vector.shape_cast %79 : vector<8xf32> to vector<8x1xf32>
    %cst_43 = arith.constant 9.600000e+01 : f32
    %81 = vector.broadcast %cst_43 : f32 to vector<8x1xf32>
    %82 = arith.divf %80, %81 : vector<8x1xf32>
    %83 = vector.broadcast %75 : vector<8x1xf32> to vector<8x96xf32>
    %84 = arith.subf %71, %83 : vector<8x96xf32>
    %cst_44 = arith.constant 9.99999996E-13 : f32
    %85 = vector.broadcast %cst_44 : f32 to vector<8x1xf32>
    %86 = arith.addf %82, %85 : vector<8x1xf32>
    %87 = math.rsqrt %86 : vector<8x1xf32>
    %88 = vector.broadcast %87 : vector<8x1xf32> to vector<8x96xf32>
    %89 = arith.mulf %84, %88 : vector<8x96xf32>
    %90 = vector.broadcast %20 : vector<1x96xf32> to vector<8x96xf32>
    %91 = arith.mulf %90, %89 : vector<8x96xf32>
    %92 = vector.broadcast %22 : vector<1x96xf32> to vector<8x96xf32>
    %93 = arith.addf %91, %92 : vector<8x96xf32>
    %94 = arith.mulf %93, %10 : vector<8x96xf32>
    %c1 = arith.constant 1 : index
    %c0_45 = arith.constant 0 : index
    %c0_46 = arith.constant 0 : index
    %95 = vector.load %arg4[%c1, %c0_45, %c0_46] : memref<2x96x96xf32, #tpu.memory_space<vmem>>, vector<1x96x96xf32>
    %96 = vector.shape_cast %95 : vector<1x96x96xf32> to vector<96x96xf32>
    %c1_47 = arith.constant 1 : index
    %c0_48 = arith.constant 0 : index
    %c0_49 = arith.constant 0 : index
    %97 = vector.load %arg5[%c1_47, %c0_48, %c0_49] : memref<2x1x96xf32, #tpu.memory_space<vmem>>, vector<1x1x96xf32>
    %98 = vector.shape_cast %97 : vector<1x1x96xf32> to vector<1x96xf32>
    %c1_50 = arith.constant 1 : index
    %c0_51 = arith.constant 0 : index
    %c0_52 = arith.constant 0 : index
    %99 = vector.load %arg6[%c1_50, %c0_51, %c0_52] : memref<2x96x96xf32, #tpu.memory_space<vmem>>, vector<1x96x96xf32>
    %100 = vector.shape_cast %99 : vector<1x96x96xf32> to vector<96x96xf32>
    %c1_53 = arith.constant 1 : index
    %c0_54 = arith.constant 0 : index
    %c0_55 = arith.constant 0 : index
    %101 = vector.load %arg7[%c1_53, %c0_54, %c0_55] : memref<2x1x96xf32, #tpu.memory_space<vmem>>, vector<1x1x96xf32>
    %102 = vector.shape_cast %101 : vector<1x1x96xf32> to vector<1x96xf32>
    %c1_56 = arith.constant 1 : index
    %c0_57 = arith.constant 0 : index
    %c0_58 = arith.constant 0 : index
    %103 = vector.load %arg8[%c1_56, %c0_57, %c0_58] : memref<2x1x96xf32, #tpu.memory_space<vmem>>, vector<1x1x96xf32>
    %104 = vector.shape_cast %103 : vector<1x1x96xf32> to vector<1x96xf32>
    %c1_59 = arith.constant 1 : index
    %c0_60 = arith.constant 0 : index
    %c0_61 = arith.constant 0 : index
    %105 = vector.load %arg9[%c1_59, %c0_60, %c0_61] : memref<2x1x96xf32, #tpu.memory_space<vmem>>, vector<1x1x96xf32>
    %106 = vector.shape_cast %105 : vector<1x1x96xf32> to vector<1x96xf32>
    %cst_62 = arith.constant dense<0.000000e+00> : vector<8x96xf32>
    %107 = tpu.matmul %94, %96, %cst_62 {dimension_numbers = #tpu.dot_dimension_numbers<[1], [0], [0], [1], [0, 0, 1, 1], [], []>} : vector<8x96xf32>, vector<96x96xf32>, vector<8x96xf32> -> vector<8x96xf32>
    %108 = vector.broadcast %98 : vector<1x96xf32> to vector<8x96xf32>
    %109 = arith.addf %107, %108 : vector<8x96xf32>
    %110 = vector.extract_strided_slice %66 {offsets = [0, 7, 0], sizes = [4, 1, 96], strides = [1, 1, 1]} : vector<4x8x96xf32> to vector<4x1x96xf32>
    %111 = vector.shape_cast %110 : vector<4x1x96xf32> to vector<4x96xf32>
    %cst_63 = arith.constant dense<0.000000e+00> : vector<4x96xf32>
    %112 = tpu.matmul %111, %100, %cst_63 {dimension_numbers = #tpu.dot_dimension_numbers<[1], [0], [0], [1], [0, 0, 1, 1], [], []>} : vector<4x96xf32>, vector<96x96xf32>, vector<4x96xf32> -> vector<4x96xf32>
    %113 = vector.broadcast %102 : vector<1x96xf32> to vector<4x96xf32>
    %114 = arith.addf %112, %113 : vector<4x96xf32>
    %115 = vector.shape_cast %109 : vector<8x96xf32> to vector<1x8x96xf32>
    %116 = vector.shape_cast %114 : vector<4x96xf32> to vector<4x1x96xf32>
    %117 = vector.broadcast %115 : vector<1x8x96xf32> to vector<4x8x96xf32>
    %118 = vector.broadcast %116 : vector<4x1x96xf32> to vector<4x8x96xf32>
    %119 = arith.addf %117, %118 : vector<4x8x96xf32>
    %cst_64 = arith.constant 0.000000e+00 : f32
    %120 = vector.broadcast %cst_64 : f32 to vector<4x8x96xf32>
    %121 = arith.maximumf %119, %120 : vector<4x8x96xf32>
    %122 = arith.addf %121, %66 : vector<4x8x96xf32>
    %cst_65 = arith.constant dense<0.000000e+00> : vector<4x8xf32>
    %123 = vector.multi_reduction <add>, %122, %cst_65 [2] : vector<4x8x96xf32> to vector<4x8xf32>
    %124 = vector.shape_cast %123 : vector<4x8xf32> to vector<4x8x1xf32>
    %cst_66 = arith.constant 9.600000e+01 : f32
    %125 = vector.broadcast %cst_66 : f32 to vector<4x8x1xf32>
    %126 = arith.divf %124, %125 : vector<4x8x1xf32>
    %127 = vector.broadcast %126 : vector<4x8x1xf32> to vector<4x8x96xf32>
    %128 = arith.subf %122, %127 : vector<4x8x96xf32>
    %129 = arith.mulf %128, %128 : vector<4x8x96xf32>
    %cst_67 = arith.constant dense<0.000000e+00> : vector<4x8xf32>
    %130 = vector.multi_reduction <add>, %129, %cst_67 [2] : vector<4x8x96xf32> to vector<4x8xf32>
    %131 = vector.shape_cast %130 : vector<4x8xf32> to vector<4x8x1xf32>
    %cst_68 = arith.constant 9.600000e+01 : f32
    %132 = vector.broadcast %cst_68 : f32 to vector<4x8x1xf32>
    %133 = arith.divf %131, %132 : vector<4x8x1xf32>
    %134 = vector.broadcast %126 : vector<4x8x1xf32> to vector<4x8x96xf32>
    %135 = arith.subf %122, %134 : vector<4x8x96xf32>
    %cst_69 = arith.constant 9.99999996E-13 : f32
    %136 = vector.broadcast %cst_69 : f32 to vector<4x8x1xf32>
    %137 = arith.addf %133, %136 : vector<4x8x1xf32>
    %138 = math.rsqrt %137 : vector<4x8x1xf32>
    %139 = vector.broadcast %138 : vector<4x8x1xf32> to vector<4x8x96xf32>
    %140 = arith.mulf %135, %139 : vector<4x8x96xf32>
    %141 = vector.shape_cast %104 : vector<1x96xf32> to vector<1x1x96xf32>
    %142 = vector.broadcast %141 : vector<1x1x96xf32> to vector<4x8x96xf32>
    %143 = arith.mulf %142, %140 : vector<4x8x96xf32>
    %144 = vector.shape_cast %106 : vector<1x96xf32> to vector<1x1x96xf32>
    %145 = vector.broadcast %144 : vector<1x1x96xf32> to vector<4x8x96xf32>
    %146 = arith.addf %143, %145 : vector<4x8x96xf32>
    %147 = arith.mulf %146, %6 : vector<4x8x96xf32>
    %c0_70 = arith.constant 0 : index
    %c0_71 = arith.constant 0 : index
    %c0_72 = arith.constant 0 : index
    %c0_73 = arith.constant 0 : index
    %148 = vector.load %arg12[%c0_70, %c0_71, %c0_72, %c0_73] : memref<1x4x8x96xf32, #tpu.memory_space<vmem>>, vector<1x4x8x96xf32>
    %149 = vector.shape_cast %148 : vector<1x4x8x96xf32> to vector<4x8x96xf32>
    %150 = vector.shape_cast %147 : vector<4x8x96xf32> to vector<1x4x8x96xf32>
    tpu.vector_store %arg12[%c0_70, %c0_71, %c0_72, %c0_73], %150 {strides = array<i32>} : memref<1x4x8x96xf32, #tpu.memory_space<vmem>>, vector<1x4x8x96xf32>,
    return
  }
  func.func @transform_0(%arg0: i32, %arg1: i32) -> (i32, i32, i32, i32) {
    %c0_i32 = arith.constant 0 : i32
    %c0_i32_0 = arith.constant 0 : i32
    %c0_i32_1 = arith.constant 0 : i32
    return %arg0, %arg1, %c0_i32, %c0_i32_0 : i32, i32, i32, i32
  }
  func.func @transform_1(%arg0: i32, %arg1: i32) -> (i32, i32, i32, i32) {
    %c0_i32 = arith.constant 0 : i32
    %c0_i32_0 = arith.constant 0 : i32
    %c0_i32_1 = arith.constant 0 : i32
    %c0_i32_2 = arith.constant 0 : i32
    return %arg0, %c0_i32, %c0_i32_0, %c0_i32_1 : i32, i32, i32, i32
  }
  func.func @transform_2(%arg0: i32, %arg1: i32) -> (i32, i32, i32) {
    %c0_i32 = arith.constant 0 : i32
    %c0_i32_0 = arith.constant 0 : i32
    %c0_i32_1 = arith.constant 0 : i32
    %c0_i32_2 = arith.constant 0 : i32
    return %c0_i32, %c0_i32_0, %c0_i32_1 : i32, i32, i32
  }
  func.func @transform_3(%arg0: i32, %arg1: i32) -> (i32, i32, i32) {
    %c0_i32 = arith.constant 0 : i32
    %c0_i32_0 = arith.constant 0 : i32
    %c0_i32_1 = arith.constant 0 : i32
    %c0_i32_2 = arith.constant 0 : i32
    return %c0_i32, %c0_i32_0, %c0_i32_1 : i32, i32, i32
  }
  func.func @transform_4(%arg0: i32, %arg1: i32) -> (i32, i32, i32) {
    %c0_i32 = arith.constant 0 : i32
    %c0_i32_0 = arith.constant 0 : i32
    %c0_i32_1 = arith.constant 0 : i32
    %c0_i32_2 = arith.constant 0 : i32
    return %c0_i32, %c0_i32_0, %c0_i32_1 : i32, i32, i32
  }
  func.func @transform_5(%arg0: i32, %arg1: i32) -> (i32, i32, i32) {
    %c0_i32 = arith.constant 0 : i32
    %c0_i32_0 = arith.constant 0 : i32
    %c0_i32_1 = arith.constant 0 : i32
    %c0_i32_2 = arith.constant 0 : i32
    return %c0_i32, %c0_i32_0, %c0_i32_1 : i32, i32, i32
  }
  func.func @transform_6(%arg0: i32, %arg1: i32) -> (i32, i32, i32) {
    %c0_i32 = arith.constant 0 : i32
    %c0_i32_0 = arith.constant 0 : i32
    %c0_i32_1 = arith.constant 0 : i32
    %c0_i32_2 = arith.constant 0 : i32
    return %c0_i32, %c0_i32_0, %c0_i32_1 : i32, i32, i32
  }
  func.func @transform_7(%arg0: i32, %arg1: i32) -> (i32, i32, i32) {
    %c0_i32 = arith.constant 0 : i32
    %c0_i32_0 = arith.constant 0 : i32
    %c0_i32_1 = arith.constant 0 : i32
    %c0_i32_2 = arith.constant 0 : i32
    return %c0_i32, %c0_i32_0, %c0_i32_1 : i32, i32, i32
  }
  func.func @transform_8(%arg0: i32, %arg1: i32) -> (i32, i32, i32) {
    %c0_i32 = arith.constant 0 : i32
    %c0_i32_0 = arith.constant 0 : i32
    %c0_i32_1 = arith.constant 0 : i32
    return %arg1, %c0_i32, %c0_i32_0 : i32, i32, i32
  }
  func.func @transform_9(%arg0: i32, %arg1: i32) -> (i32, i32, i32) {
    %c0_i32 = arith.constant 0 : i32
    %c0_i32_0 = arith.constant 0 : i32
    %c0_i32_1 = arith.constant 0 : i32
    %c0_i32_2 = arith.constant 0 : i32
    return %c0_i32, %c0_i32_0, %c0_i32_1 : i32, i32, i32
  }
  func.func @transform_10(%arg0: i32, %arg1: i32) -> (i32, i32, i32, i32) {
    %c0_i32 = arith.constant 0 : i32
    %c0_i32_0 = arith.constant 0 : i32
    %c0_i32_1 = arith.constant 0 : i32
    return %arg0, %arg1, %c0_i32, %c0_i32_0 : i32, i32, i32, i32
  }
}

</mosaic_0001>

<bundles_post_ra>
// kernel: tpu_custom_call.1
= control target key start
LH: loop header
LB: loop body
LE: loop exit
PB: predicated region body
PF: predicated region fallthrough
CT: control target
= control target key end

     0   :  { %s2712_s0 = inlined_call_operand.vmem [shape: f32[2,8,8,96], index: 0, kind: input, shape index: {}]   ;;  %s2713_s1 = inlined_call_operand.hbm [shape: f32[2,8,8,96], index: 1, kind: input, shape index: {}]   ;;  %s2714_s2 = inlined_call_operand.hbm [shape: f32[2,96,96], index: 2, kind: input, shape index: {}]   ;;  %s2715_s3 = inlined_call_operand.vmem [shape: f32[2,1,96], index: 3, kind: input, shape index: {}]   ;;  %s2716_s4 = inlined_call_operand.hbm [shape: f32[2,96,96], index: 4, kind: input, shape index: {}]   ;;  %s2717_s5 = inlined_call_operand.vmem [shape: f32[2,1,96], index: 5, kind: input, shape index: {}]   ;;  %s2718_s6 = inlined_call_operand.vmem [shape: f32[2,1,96], index: 6, kind: input, shape index: {}]   ;;  %s2719_s7 = inlined_call_operand.vmem [shape: f32[2,1,96], index: 7, kind: input, shape index: {}]   ;;  %s2720_s8 = inlined_call_operand.vmem [shape: f32[8,8,1], index: 8, kind: input, shape index: {}]   ;;  %s2721_s9 = inlined_call_operand.vmem [shape: f32[8,8,1], index: 9, kind: input, shape index: {}]   ;;  %s2722_s10 = inlined_call_operand.hbm [shape: f32[2,8,8,96], index: 10, kind: output, shape index: {}]  }
   0x1   :  { %2739 = sst [smem:[#allocation18_spill]] %s2714_s2 }
   0x2   :  { %2740 = sst [smem:[#allocation19_spill]] %s2716_s4 }
   0x3   :  { %2741 = sst [smem:[#allocation20_spill]] %s2718_s6 }
   0x4   :  { %2742 = sst [smem:[#allocation21_spill]] %s2719_s7 }
   0x5   :  { %2743 = sst [smem:[#allocation22_spill]] %s2720_s8 }
   0x6   :  { %2744 = sst [smem:[#allocation23_spill]] %s2721_s9 }
   0x7   :  { %2745 = sst [smem:[#allocation24_spill]] %s2722_s10 }
   0x8   :  { %15 = vsyncpa [#allocation3], 0 }
   0x9   :  { %17 = vsyncpa [#allocation3 + $0x1], 0 }
   0xa   :  { %18 = vsyncpa [#allocation6], 0 }
   0xb   :  { %19 = vsyncpa [#allocation4], 0 }
   0xc   :  { %21 = vsyncpa [#allocation4 + $0x1], 0  ;;  %s2200_s13 = smov 0   ;;  %s2202_s14 = smov 0  }
   0xd   :  { %s2204_s15 = smov 0   ;;  %s2206_s16 = smov 0  }
   0xe   :  { %s2208_s17 = smov 0   ;;  %s2210_s18 = smov 0  }
   0xf   :  { %s2212_s19 = smov 0   ;;  %s2214_s20 = smov 0  }
  0x10   :  { %s2216_s21 = smov 0   ;;  %s2218_s22 = smov 0  }
  0x11   :  { %s2220_s23 = smov 0  }
  0x12 LB: > { %2746 = sst [smem:[#allocation12_spill]] %s2090_s13  ;;  %s1434_s24 = sadd.s32 4294967295, %s2130_s23   ;;  %s2130_s23 = sphi %s2220_s23, %s27_s23   ;;  %s2126_s22 = sphi %s2218_s22, %s2786_s22   ;;  %s2122_s21 = sphi %s2216_s21, %s2778_s21   ;;  %s2118_s20 = sphi %s2214_s20, %s2785_s20   ;;  %s2114_s19 = sphi %s2212_s19, %s2777_s19   ;;  %s2110_s18 = sphi %s2210_s18, %s2784_s18   ;;  %s2106_s17 = sphi %s2208_s17, %s2783_s17   ;;  %s2102_s16 = sphi %s2206_s16, %s2782_s16   ;;  %s2098_s15 = sphi %s2204_s15, %s2781_s15   ;;  %s2094_s14 = sphi %s2202_s14, %s2780_s14   ;;  %s2090_s13 = sphi %s2200_s13, %s2776_s13  }
  0x13   : > { %2747 = sst [smem:[#allocation13_spill]] %s2094_s14  ;;  %s1435_s25 = sadd.s32 4294967294, %s2130_s23  }
  0x14   : > { %2748 = sst [smem:[#allocation14_spill]] %s2122_s21  ;;  %p87_p0 = scmp.ne.s32.totalorder %s2106_s17, %s2102_s16 }
  0x15   : > { %p2256_p1 = scmp.eq.s32.totalorder %s1434_s24, 0  ;;  %p285_p2 = scmp.ne.s32.totalorder %s2098_s15, %s2094_s14 }
  0x16   : > { %p286_p3 = scmp.eq.s32.totalorder %s1434_s24, 3  ;;  %p291_p5 = scmp.ne.s32.totalorder %s2094_s14, %s2090_s13 }
  0x17   : > { %s2749_s26 = scalar_select %p2256_p1, 1, 0 }
  0x18   : > { %p2264_p4 = por %p2256_p1, %p87_p0  ;;  %p2270_p6 = por %p286_p3, %p285_p2 }
  0x19   : > { %p292_p7 = scmp.eq.s32.totalorder %s1435_s25, 3  ;;  %p1436_p8 = scmp.ge.s32.totalorder %s2130_s23, 1 }
  0x1a   : > { %s2750_s27 = scalar_select %p2264_p4, 1, 0 }
  0x1b   : > { %s2751_s28 = scalar_select %p2270_p6, 1, 0 }
  0x1c   : > { %p299_p9 = scmp.lt.s32.totalorder %s2130_s23, 5  ;;  %p2276_p10 = por %p292_p7, %p291_p5 }
  0x1d   : > { %2752 = sst [smem:[#allocation15_spill]] %s2751_s28  ;;  %s2132_s11 = smov [#allocation5]  }
  0x1e   : > { %s2753_s29 = scalar_select %p2276_p10, 1, 0 }
  0x1f   : > { %p2280_p11 = pnand %p1436_p8, %p299_p9  ;;  %s311_s12 = sshll.u32 %s2132_s11, 4  ;;  %s312_s12 = int_to_ptr.vmem [resolvable:$true] %s311_s12 }
  0x20   : > { %2754 = sst [smem:[#allocation16_spill]] %s2753_s29  ;;  %s2133_s24 = smov [#allocation7]  }
  0x21   : > { %s2755_s30 = scalar_select %p2280_p11, 1, 0 }
  0x22   : > { %p1778_p12 = pneg %p2280_p11  ;;  %s327_s25 = sshll.u32 %s2133_s24, 4  ;;  %s2292_s25 = int_to_ptr.vmem [resolvable:$true] %s327_s25 }
  0x23   : > { %s2757_s2 = sld [smem:[#allocation18_spill]] }
  0x24   : > { %p2288_p13 = pnand %p1778_p12, %p2256_p1 }
  0x26   : > { %p1920_p2 = pneg %p2288_p13 }
  0x29   : > { %s1918_s10 = scalar_lea.hbm %s2757_s2, 3072 }
  0x2a   : > { %p1919_p0 = scmp.ne.s32.totalorder %s2757_s2, %s1918_s10  ;;  %p1925_p7 = scmp.lt.u32.totalorder %s1918_s10, %s2757_s2 }
  0x2c   : > { %p1921_p3 = pnand %p1920_p2, %p1919_p0 }
  0x2e   : > { %p1922_p5 = pneg %p1921_p3 }
  0x30   : > { %p1927_p8 = pnand %p1925_p7, %p1922_p5 }
  0x32   : > { %1930 = shalt.err (!%p1927_p8)
}
  0x33   : > { %s1931_s24 = scalar_lea.vmem %s312_s12, 3072  ;;  %p1939_p6 = scmp.lt.s32.totalorder %s312_s12, %s312_s12 }
  0x34   : > { %p1932_p9 = scmp.ne.s32.totalorder %s312_s12, %s1931_s24  ;;  %p1940_p1 = scmp.lt.s32.totalorder %s1931_s24, %s1931_s24 }
  0x36   : > { %p1934_p12 = pnand %p1932_p9, %p1920_p2  ;;  %p1941_p4 = por %p1940_p1, %p1939_p6 }
  0x38   : > { %p1935_p10 = pneg %p1934_p12 }
  0x3a   : > { %p1942_p11 = pnand %p1941_p4, %p1935_p10 }
  0x3c   : > { %1945 = shalt.err (!%p1942_p11)
}
  0x3d   : > { %s2134_s13 = smov 128   ;;  %s2135_s28 = smov 8  }
  0x3e   : > { %1781 = dma.hbm_to_vmem [thread:$0]  (!%p2288_p13), %s2757_s2, 3072, %s312_s12, [#allocation6], %s2134_s13, %s2134_s13, %s2135_s28  }
  0x3f   : > { %s2758_s4 = sld [smem:[#allocation19_spill]] }
  0x45   : > { %s1946_s11 = scalar_lea.hbm %s2758_s4, 3072 }
  0x46   : > { %p1947_p0 = scmp.ne.s32.totalorder %s2758_s4, %s1946_s11  ;;  %p1953_p6 = scmp.lt.u32.totalorder %s1946_s11, %s2758_s4 }
  0x48   : > { %p1949_p1 = pnand %p1947_p0, %p1920_p2 }
  0x4a   : > { %p1950_p4 = pneg %p1949_p1 }
  0x4c   : > { %p1955_p10 = pnand %p1953_p6, %p1950_p4 }
  0x4e   : > { %1958 = shalt.err (!%p1955_p10)
}
  0x4f   : > { %s1959_s12 = scalar_lea.vmem %s2292_s25, 3072  ;;  %p1967_p7 = scmp.lt.s32.totalorder %s2292_s25, %s2292_s25 }
  0x50   : > { %p1960_p11 = scmp.ne.s32.totalorder %s2292_s25, %s1959_s12  ;;  %p1968_p8 = scmp.lt.s32.totalorder %s1959_s12, %s1959_s12 }
  0x52   : > { %p1962_p3 = pnand %p1960_p11, %p1920_p2  ;;  %p1969_p9 = por %p1968_p8, %p1967_p7 }
  0x54   : > { %p1963_p5 = pneg %p1962_p3 }
  0x56   : > { %p1970_p12 = pnand %p1969_p9, %p1963_p5 }
  0x58   : > { %1973 = shalt.err (!%p1970_p12)
}
  0x59   : > { %1784 = dma.hbm_to_vmem [thread:$0]  (!%p2288_p13), %s2758_s4, 3072, %s2292_s25, [#allocation6], %s2134_s13, %s2134_s13, %s2135_s28  }
  0x5a   : > { %s36_s9 = sadd.s32 1, %s2122_s21  ;;  %s39_s16 = sadd.s32 1, %s2126_s22 }
  0x5b   : > { %p37_p2 = scmp.ge.s32.totalorder %s36_s9, 2  ;;  %s74_s7 = sadd.s32 1, %s2110_s18 }
  0x5c   : > { %p81_p0 = scmp.ne.s32.totalorder %s2110_s18, %s2106_s17  ;;  %p82_p1 = scmp.eq.s32.totalorder %s2130_s23, 0 }
  0x5d   : > { %s2788_s9 = smov (%p37_p2, %s36_s9), 0  ;;  %s2790_s16 = smov (!%p37_p2, %s39_s16), %s2126_s22 }
  0x5e   : > { %2759 = sst [smem:[#allocation17_spill]] %s2788_s9  ;;  %s271_s10 = ssub.s32 %s2122_s21, %s2788_s9 }
  0x5f   : > { %p41_p4 = scmp.ge.s32.totalorder %s2790_s16, 2  ;;  %s275_s14 = sadd.s32 1, %s2098_s15 }
  0x60   : > { %p2353_p6 = por %p82_p1, %p81_p0  ;;  %p1795_p13 = scmp.lt.s32.totalorder %s2130_s23, 4 }
  0x61   : > { %s2792_s16 = smov (%p41_p4, %s2790_s16), 0  ;;  %s366_s13 = sand.u32 1, %s2110_s18  }
  0x62   : > { %s1475_s28 = sshll.u32 %s2126_s22, 10  ;;  %s71_s29 = ssub.s32 %s2126_s22, %s2792_s16 }
  0x63   : > { %p72_p10 = scmp.eq.s32.totalorder %s71_s29, 0  ;;  %s272_s11 = sor.u32 %s271_s10, %s71_s29 }
  0x64   : > { %p273_p11 = scmp.eq.s32.totalorder %s272_s11, 0  ;;  %s1440_s24 = sshll.u32 %s366_s13, 3 }
  0x65   : > { %s2365_s12 = scalar_select %p72_p10, %s2110_s18, %s74_s7  }
  0x66   : > { %s2368_s6 = scalar_select %p273_p11, %s2098_s15, %s275_s14  }
  0x67   : > { %s2373_s4 = scalar_lea.hbm %s2713_s1, %s1475_s28  ;;  %s370_s9 = scalar_lea.vmem [#allocation2], %s1440_s24 }
  0x68   : > { %s378_s21 = sshll.u32 %s370_s9, 4  ;;  %p2379_p3 = pnand %p1795_p13, %p2353_p6  ;;  %s2383_s21 = int_to_ptr.vmem [resolvable:$true] %s378_s21 }
  0x69   : > { %s367_s7 = scalar_lea.sflag [#allocation3], %s366_s13  ;;  %s1974_s2 = scalar_lea.hbm %s2373_s4, 128 }
  0x6a   : > { %p1975_p5 = scmp.ne.s32.totalorder %s2373_s4, %s1974_s2  ;;  %p1976_p7 = pneg %p2379_p3 }
  0x6b   : > { %s1979_s25 = scalar_lea.hbm %s2713_s1, 2048  ;;  %p1980_p12 = scmp.lt.u32.totalorder %s2373_s4, %s2713_s1 }
  0x6c   : > { %p1977_p8 = pnand %p1976_p7, %p1975_p5  ;;  %p1981_p2 = scmp.lt.u32.totalorder %s1979_s25, %s1974_s2 }
  0x6d   : > { %p1983_p1 = scmp.lt.u32.totalorder %s1974_s2, %s2373_s4 }
  0x6e   : > { %p1978_p9 = pneg %p1977_p8  ;;  %p1982_p0 = por %p1981_p2, %p1980_p12 }
  0x70   : > { %p1984_p4 = por %p1983_p1, %p1982_p0 }
  0x72   : > { %p1985_p6 = pnand %p1984_p4, %p1978_p9 }
  0x74   : > { %1988 = shalt.err (!%p1985_p6)
}
  0x75   : > { %s1989_s13 = scalar_lea.vmem %s2383_s21, 128  ;;  %s2136_s11 = smov [#allocation2]  }
  0x76   : > { %p1990_p13 = scmp.ne.s32.totalorder %s2383_s21, %s1989_s13  ;;  %s1994_s24 = sshll.u32 %s2136_s11, 4  ;;  %s1995_s24 = int_to_ptr.vmem [resolvable:$false] %s1994_s24 }
  0x77   : > { %s1996_s8 = scalar_lea.vmem %s1995_s24, 256  ;;  %p1997_p5 = scmp.lt.s32.totalorder %s2383_s21, %s1995_s24 }
  0x78   : > { %p1992_p10 = pnand %p1990_p13, %p1976_p7  ;;  %p1998_p8 = scmp.lt.s32.totalorder %s1996_s8, %s1989_s13 }
  0x7a   : > { %p1993_p11 = pneg %p1992_p10  ;;  %p1999_p12 = por %p1998_p8, %p1997_p5 }
  0x7c   : > { %p2000_p2 = pnand %p1999_p12, %p1993_p11 }
  0x7e   : > { %2003 = shalt.err (!%p2000_p2)
}
  0x7f   : > { %1788 = dma.hbm_to_vmem [thread:$0]  (!%p2379_p3), %s2373_s4, 128, %s2383_s21, %s367_s7  }
  0x80   : > { %p2762_p9 = scmp.ne.s32.totalorder %s2755_s30, 0 }
  0x81   : > { %s398_s2 = sand.u32 (!%p2762_p9), 1, %s2106_s17   ;;  %p2763_p7 = scmp.ne.s32.totalorder (!%p2762_p9), %s2750_s27, 0 }
  0x82   : > { %396 = sbr.rel (%p2762_p9) target bundleno = 1333 (0x535), region = 60  ;;  %s2413_s9 = sshll.u32 (!%p2762_p9), %s398_s2, 3 }
  0x83   : > { %s399_s14 = scalar_lea.sflag (!%p2762_p9), [#allocation3], %s398_s2  ;;  %s402_s25 = scalar_lea.vmem (!%p2762_p9), [#allocation2], %s2413_s9 }
  0x89   : > { %2077 = dma.done.wait (%p2763_p7), %s399_s14, 128  }
  0x8a   : > { %2079 = vsyncadd (%p2763_p7), %s399_s14, 4294967168  ;;  %p2764_p0 = scmp.ne.s32.totalorder %s2749_s26, 0 }
  0x8c   : > { %2081 = dma.done.wait (%p2764_p0), [#allocation6], 6144  }
  0x8d   : > { %2083 = vsyncadd (%p2764_p0), [#allocation6], 4294961152  ;;  %s2425_s4 = sshll.u32 %s2114_s19, 2  ;;  %v2137_v0 = vmov 0.0|0.0   ;;  %p462_p3 = scmp.lt.s32.totalorder %s2118_s20, 1  ;;  %vm2138_vm0 = vmmov 0   ;;  %v622_v51 = vlaneseq }
  0x8e   : > { %1676 = vmatprep.subr.bf16.mxu0 %v2137_v0  ;;  %1694 = vmatprep.subr.bf16.mxu1 %v2137_v0  ;;  %p464_p1 = scmp.lt.s32.totalorder %s2425_s4, 7  ;;  %v2139_v1 = vmov 0.0   ;;  %v513_v2 = vld [vmem:[#allocation5] sm:$0xff]  ;;  %v514_v3 = vld [vmem:[#allocation5 + $0x8] sm:$0xff]  ;;  %v515_v7 = vld [vmem:[#allocation5 + $0x10] sm:$0xff]  ;;  %vm633_vm1 = vcmask 1041409  }
  0x8f   : > { %1592 = vmatprep.mubr.msk.f32.mxu1 %vm2138_vm0, %v2139_v1  ;;  %1565 = vmatprep.mubr.msk.f32.mxu0 %vm2138_vm0, %v2139_v1  ;;  %s463_s21 = scalar_select %p462_p3, %s2118_s20, 1  ;;  %v526_v4 = vld [vmem:[#allocation7] sm:$0xff]  ;;  %v1677_v5 = vpack.c.bf16 %v514_v3, %v513_v2  ;;  %v527_v6 = vld [vmem:[#allocation7 + $0x8] sm:$0xff]  ;;  %v516_v8 = vld [vmem:[#allocation5 + $0x18] sm:$0xff]  ;;  %vm636_vm2 = vcmask 1042434   ;;  %vm639_vm3 = vcmask 1043459  }
  0x90   : > { %s2437_s19 = scalar_select %p464_p1, %s2425_s4, 7  ;;  %v2439_v9 = vpack.c.bf16 %v527_v6, %v526_v4  ;;  %v528_v10 = vld [vmem:[#allocation7 + $0x10] sm:$0xff]  ;;  %v529_v11 = vld [vmem:[#allocation7 + $0x18] sm:$0xff]  ;;  %v1680_v12 = vpack.c.bf16 %v516_v8, %v515_v7  ;;  %v517_v14 = vld [vmem:[#allocation5 + $0x20] sm:$0xff]  ;;  %vm547_vm4 = vcmask 785408   ;;  %v623_v52 = vshrl.u32 %v622_v51, 7 }
  0x91   : > { %s1449_s26 = sshll.u32 %s463_s21, 3  ;;  %1678 = vmatpush3.bf16.msra.mxu0 %v1677_v5  ;;  %v2444_v13 = vpack.c.bf16 %v529_v11, %v528_v10  ;;  %v518_v15 = vld [vmem:[#allocation5 + $0x28] sm:$0xff]  ;;  %v530_v16 = vld [vmem:[#allocation7 + $0x20] sm:$0xff]  ;;  %v519_v20 = vld [vmem:[#allocation5 + $0x30] sm:$0xff]  ;;  %v2140_v53 = vmov 1966171168  }
  0x92   : > { %s467_s27 = sadd.s32 %s1449_s26, %s2437_s19  ;;  %1696 = vmatpush3.bf16.msra.mxu1 %v2439_v9  ;;  %1679 = vmatprep.subr.bf16.mxu0 %v2137_v0  ;;  %v531_v17 = vld [vmem:[#allocation7 + $0x28] sm:$0xff]  ;;  %v1683_v18 = vpack.c.bf16 %v518_v15, %v517_v14  ;;  %v520_v21 = vld [vmem:[#allocation5 + $0x38] sm:$0xff]  ;;  %v532_v22 = vld [vmem:[#allocation7 + $0x30] sm:$0xff]  ;;  %v788_v54 = vunpack.c.l.s4 %v2140_v53  ;;  %v2499_v55 = vsub.s32 0, %v623_v52  ;;  %s1452_s8 = sshll.u32 %s2437_s19, 3 }
  0x93   : > { %1697 = vmatprep.subr.bf16.mxu1 %v2137_v0  ;;  %s1450_s30 = sshll.u32 %s467_s27, 3  ;;  %v1701_v19 = vpack.c.bf16 %v531_v17, %v530_v16  ;;  %v533_v23 = vld [vmem:[#allocation7 + $0x38] sm:$0xff]  ;;  %v1686_v24 = vpack.c.bf16 %v520_v21, %v519_v20  ;;  %v521_v28 = vld [vmem:[#allocation5 + $0x40] sm:$0xff]  ;;  %v522_v29 = vld [vmem:[#allocation5 + $0x48] sm:$0xff]  ;;  %s2765_s14 = sld [smem:[#allocation22_spill]] }
  0x94   : > { %s469_s28 = scalar_lea.vmem %s2712_s0, %s1450_s30  ;;  %v1704_v27 = vpack.c.bf16 %v533_v23, %v532_v22  ;;  %v534_v30 = vld [vmem:[#allocation7 + $0x40] sm:$0xff]  ;;  %v535_v31 = vld [vmem:[#allocation7 + $0x48] sm:$0xff]  ;;  %v1689_v35 = vpack.c.bf16 %v522_v29, %v521_v28  ;;  %v523_v37 = vld [vmem:[#allocation5 + $0x50] sm:$0xff]  ;;  %v789_v57 = vunpack.c.0.s8 %v788_v54  ;;  %s2766_s26 = sld [smem:[#allocation23_spill]] }
  0x95   : > { %1681 = vmatpush3.bf16.msra.mxu0 %v1680_v12  ;;  %v2453_v25 = vld [vmem:[%s469_s28] sm:$0xff]  ;;  %v2455_v26 = vld [vmem:[%s469_s28 + $0x8] sm:$0xff]  ;;  %v2459_v32 = vld [vmem:[%s469_s28 + $0x10] sm:$0xff]  ;;  %v1707_v36 = vpack.c.bf16 %v535_v31, %v534_v30  ;;  %s2767_s10 = sld [smem:[#allocation20_spill]]  ;;  %s2768_s29 = sld [smem:[#allocation21_spill]] }
  0x96   : > { %1699 = vmatpush3.bf16.msra.mxu1 %v2444_v13  ;;  %1682 = vmatprep.subr.bf16.mxu0 %v2137_v0  ;;  %v631_v33 = vrot.slane %v2453_v25, 7  ;;  %v632_v34 = vrot.slane %v2455_v26, 6  ;;  %v524_v38 = vld [vmem:[#allocation5 + $0x58] sm:$0xff]  ;;  %v536_v39 = vld [vmem:[#allocation7 + $0x50] sm:$0xff]  ;;  %v2465_v41 = vld [vmem:[%s469_s28 + $0x18] sm:$0xff]  ;;  %v635_v42 = vrot.slane %v2459_v32, 5  ;;  %v2505_v59 = vsub.s32 %v789_v57, %v623_v52 }
  0x97   : > { %1700 = vmatprep.subr.bf16.mxu1 %v2137_v0  ;;  %v537_v40 = vld [vmem:[#allocation7 + $0x58] sm:$0xff]  ;;  %v1692_v44 = vpack.c.bf16 %v524_v38, %v523_v37  ;;  %v638_v46 = vrot.slane %v2465_v41, 4  ;;  %v538_v56 = vld [vmem:[%s2717_s5] sm:$0x1]  ;;  %v2141_v38 = vmov 0   ;;  %s2769_s2 = sld [smem:[#allocation13_spill]] }
  0x98   : > { %v634_v43 = vsel %vm633_vm1, %v632_v34, %v631_v33  ;;  %v1710_v45 = vpack.c.bf16 %v537_v40, %v536_v39  ;;  %v2475_v48 = vld [vmem:[%s402_s25] sm:$0xff]  ;;  %v625_v58 = vrot.slane %v538_v56, %v2499_v55  ;;  %1899 = vset.pattern.permute.xlu1 %v2141_v38  ;;  %1898 = vset.pattern.permute.xlu0 %v2141_v38  ;;  %v952_v38 = vld [vmem:[#allocation5 + $0xa0] sm:$0xff]  ;;  %s1471_s27 = sshll.u32 %s2118_s20, 3  ;;  %s2770_s28 = sld [smem:[#allocation15_spill]] }
  0x99   : > { %1684 = vmatpush3.bf16.msra.mxu0 %v1683_v18  ;;  %v637_v47 = vsel %vm636_vm2, %v635_v42, %v634_v43  ;;  %v713_v50 = vrot.slane %v2475_v48, 7  ;;  %v1453_v2 = vld [vmem:[%s2715_s3] ss:$0 sm:$0xff]  ;;  %s475_s25 = scalar_lea.vmem %s2765_s14, %s1452_s8  ;;  %s1295_s30 = sadd.s32 %s1471_s27, %s2425_s4 }
  0x9a   : > { %1702 = vmatpush3.bf16.msra.mxu1 %v1701_v19  ;;  %1685 = vmatprep.subr.bf16.mxu0 %v2137_v0  ;;  %v640_v49 = vsel %vm639_vm3, %v638_v46, %v637_v47  ;;  %s1472_s13 = sshll.u32 %s1295_s30, 7  ;;  %s2771_s24 = sld [smem:[#allocation24_spill]] }
  0x9b   : > { %1703 = vmatprep.subr.bf16.mxu1 %v2137_v0  ;;  %s2142_s21 = smov [#allocation8]  }
  0x9c   : > { %s2008_s19 = sshll.u32 %s2142_s21, 4  ;;  %s2009_s19 = int_to_ptr.vmem [resolvable:$false] %s2008_s19 }
  0x9d   : > { %1687 = vmatpush3.bf16.msra.mxu0 %v1686_v24 }
  0x9e   : > { %1705 = vmatpush3.bf16.msra.mxu1 %v1704_v27  ;;  %1688 = vmatprep.subr.bf16.mxu0 %v2137_v0  ;;  %p2772_p6 = scmp.ne.s32.totalorder %s2770_s28, 0 }
  0x9f   : > { %1706 = vmatprep.subr.bf16.mxu1 %v2137_v0 }
  0xa0   : > { %s2642_s8 = scalar_lea.hbm %s2771_s24, %s1472_s13 }
  0xa1   : > { %1690 = vmatpush3.bf16.msra.mxu0 %v1689_v35 }
  0xa2   : > { %1708 = vmatpush3.bf16.msra.mxu1 %v1707_v36  ;;  %1691 = vmatprep.subr.bf16.mxu0 %v2137_v0 }
  0xa3   : > { %1709 = vmatprep.subr.bf16.mxu1 %v2137_v0 }
  0xa5   : > { %1693 = vmatpush3.bf16.msra.mxu0 %v1692_v44 }
  0xa6   : > { %1711 = vmatpush3.bf16.msra.mxu1 %v1710_v45  ;;  %1712 = vmatprep.subr.bf16.mxu0 %v2137_v0 }
  0xa7   : > { %1730 = vmatprep.subr.bf16.mxu1 %v2137_v0 }
  0xa8   : > { %1566 = vmatmul.mubr.msk.f32.vlgmr.msra.gmra.mrb[0].mxu0 %vm547_vm4, %v2475_v48 }
  0xa9   : > { %1593 = vmatmul.mubr.msk.f32.vlgmr.msra.gmra.mrb[0].mxu1 %vm547_vm4, %v640_v49  ;;  %1714 = vmatpush3.bf16.msra.mxu0 %v2439_v9 }
  0xaa   : > { %1715 = vmatprep.subr.bf16.mxu0 %v2137_v0  ;;  %1619 = vmatprep.mubr.msk.f32.mxu0 %vm2138_vm0, %v2139_v1 }
  0xab   : > { %1646 = vmatprep.mubr.msk.f32.mxu1 %vm2138_vm0, %v2139_v1 }
  0xad   : > { %1717 = vmatpush3.bf16.msra.mxu0 %v2444_v13 }
  0xae   : > { %1718 = vmatprep.subr.bf16.mxu0 %v2137_v0 }
  0xb1   : > { %1720 = vmatpush3.bf16.msra.mxu0 %v1701_v19 }
  0xb2   : > { %1721 = vmatprep.subr.bf16.mxu0 %v2137_v0 }
  0xb5   : > { %1723 = vmatpush3.bf16.msra.mxu0 %v1704_v27 }
  0xb6   : > { %1724 = vmatprep.subr.bf16.mxu0 %v2137_v0 }
  0xb9   : > { %1726 = vmatpush3.bf16.msra.mxu0 %v1707_v36 }
  0xba   : > { %1727 = vmatprep.subr.bf16.mxu0 %v2137_v0 }
  0xbd   : > { %1729 = vmatpush3.bf16.msra.mxu0 %v1710_v45 }
  0xbe   : > { %1748 = vmatprep.subr.bf16.mxu0 %v2137_v0 }
  0xc0   : > { %1620 = vmatmul.mubr.msk.f32.vlgmr.msra.gmra.mrb[2].mxu0 %vm547_vm4, %v713_v50 }
  0xc1   : > { %1673 = vmatprep.mubr.msk.f32.mxu0 %vm2138_vm0, %v2139_v1 }
 0x17b   : > { %v617_v60 = vpop.f32.mrb[0].mxu0 }
 0x17c   : > { %v709_v61 = vpop.f32.mrb[0].mxu1  ;;  %v1567_v62 = vpop.f32.mrb[1].mxu0  ;;  %v618_v6 = vadd.f32 %v1453_v2, %v617_v60 }
 0x17d   : > { %v710_v63 = vadd.f32 %v709_v61, %v625_v58  ;;  %v1594_v1 = vpop.f32.mrb[1].mxu1  ;;  %v484_v61 = vld [vmem:[%s475_s25 + $0x8] sm:$0xff]  ;;  %v485_v62 = vld [vmem:[%s475_s25 + $0x10] sm:$0xff] }
 0x17e   : > { %v960_v1 = vld [vmem:[#allocation7 + $0x68] sm:$0xff] }
 0x17f   : > { %v793_v3 = vrot.slane %v710_v63, %v2505_v59  ;;  %v959_v63 = vld [vmem:[#allocation7 + $0x60] sm:$0xff] }
 0x180   : > { %v1749_v2 = vpack.c.bf16 %v960_v1, %v959_v63  ;;  %v1458_v1 = vld [vmem:[%s2768_s29] ss:$0 sm:$0xff] }
 0x181   : > { %v794_v4 = vcombine.high %v793_v3, %v793_v3  ;;  %v801_v5 = vrot.slane %v793_v3, %v2505_v59  ;;  %v486_v3 = vld [vmem:[%s475_s25 + $0x18] sm:$0xff] }
 0x182   : > { %1750 = vmatpush3.bf16.msra.mxu0 %v1749_v2 }
 0x183   : > { %v808_v7 = vrot.slane %v794_v4, %v2505_v59  ;;  %v809_v8 = vcombine.high %v801_v5, %v801_v5  ;;  %v814_v9 = vrot.slane %v801_v5, %v2499_v55  ;;  %v483_v4 = vld [vmem:[%s475_s25] sm:$0xff]  ;;  %1751 = vmatprep.subr.bf16.mxu0 %v2137_v0  ;;  %s458_s25 = sand.u32 1, %s2769_s2  }
 0x184   : > { %v961_v5 = vld [vmem:[#allocation7 + $0x70] sm:$0xff]  ;;  %s2651_s9 = scalar_lea.sflag [#allocation4], %s458_s25 }
 0x185   : > { %v810_v10 = vcombine.high %v808_v7, %v808_v7  ;;  %v831_v11 = vadd.f32 %v814_v9, %v618_v6  ;;  %v822_v12 = vrot.slane %v809_v8, %v2499_v55  ;;  %v818_v13 = vrot.slane %v808_v7, %v2499_v55  ;;  %v963_v8 = vld [vmem:[#allocation7 + $0x80] sm:$0xff]  ;;  %v964_v9 = vld [vmem:[#allocation7 + $0x88] sm:$0xff] }
 0x187   : > { %v835_v14 = vmax.f32 %v831_v11, 0.0  ;;  %v833_v15 = vadd.f32 %v822_v12, %v618_v6  ;;  %v832_v16 = vadd.f32 %v818_v13, %v618_v6  ;;  %v826_v17 = vrot.slane %v810_v10, %v2499_v55  ;;  %v965_v11 = vld [vmem:[#allocation7 + $0x90] sm:$0xff]  ;;  %v966_v12 = vld [vmem:[#allocation7 + $0x98] sm:$0xff] }
 0x188   : > { %v1755_v10 = vpack.c.bf16 %v964_v9, %v963_v8  ;;  %v1758_v13 = vpack.c.bf16 %v966_v12, %v965_v11 }
 0x189   : > { %v839_v18 = vadd.f32 %v835_v14, %v2453_v25  ;;  %v837_v19 = vmax.f32 %v833_v15, 0.0  ;;  %v836_v20 = vmax.f32 %v832_v16, 0.0  ;;  %v834_v21 = vadd.f32 %v826_v17, %v618_v6  ;;  %v967_v14 = vld [vmem:[#allocation7 + $0xa0] sm:$0xff]  ;;  %v968_v15 = vld [vmem:[#allocation7 + $0xa8] sm:$0xff]  ;;  %v969_v17 = vld [vmem:[#allocation7 + $0xb0] sm:$0xff] }
 0x18a   : > { %v1761_v16 = vpack.c.bf16 %v968_v15, %v967_v14 }
 0x18b   : > { %v843_v22 = vsel %vm547_vm4, %v839_v18, 0.0  ;;  %v841_v23 = vadd.f32 %v837_v19, %v2459_v32  ;;  %v840_v24 = vadd.f32 %v836_v20, %v2455_v26  ;;  %v838_v27 = vmax.f32 %v834_v21, 0.0 }
 0x18c   : > { %844 = vadd.xlane.f32.xlu0 %v843_v22 }
 0x18d   : > { %v849_v28 = vsel %vm547_vm4, %v841_v23, 0.0  ;;  %v842_v29 = vadd.f32 %v838_v27, %v2465_v41  ;;  %v846_v30 = vsel %vm547_vm4, %v840_v24, 0.0  ;;  %v944_v27 = vld [vmem:[#allocation5 + $0x60] sm:$0xff] }
 0x18e   : > { %850 = vadd.xlane.f32.xlu1 %v849_v28  ;;  %v945_v28 = vld [vmem:[#allocation5 + $0x68] sm:$0xff] }
 0x18f   : > { %v852_v25 = vsel %vm547_vm4, %v842_v29, 0.0 }
 0x190   : > { %847 = vadd.xlane.f32.xlu0 %v846_v30  ;;  %v507_v30 = vld [vmem:[%s2766_s26] sm:$0xff]  ;;  %s1447_s26 = sshll.u32 %s458_s25, 5 }
 0x191   : > { %s460_s7 = scalar_lea.vmem [#allocation8], %s1447_s26  ;;  %s2010_s26 = scalar_lea.vmem %s2009_s19, 1024 }
 0x192   : > { %853 = vadd.xlane.f32.xlu1 %v852_v25  ;;  %v946_v25 = vld [vmem:[#allocation5 + $0x70] sm:$0xff]  ;;  %s1298_s20 = sshll.u32 %s460_s7, 4  ;;  %s2645_s20 = int_to_ptr.vmem [resolvable:$true] %s1298_s20 }
 0x193   : > { %v782_v31 = vpop.f32.mrb[2].mxu0  ;;  %s2004_s14 = scalar_lea.vmem %s2645_s20, 512  ;;  %p2011_p11 = scmp.lt.s32.totalorder %s2645_s20, %s2009_s19 }
 0x194   : > { %v783_v33 = vadd.f32 %v782_v31, %v538_v56  ;;  %v1621_v34 = vpop.f32.mrb[3].mxu0  ;;  %v947_v31 = vld [vmem:[#allocation5 + $0x78] sm:$0xff]  ;;  %p2005_p4 = scmp.ne.s32.totalorder %s2645_s20, %s2004_s14  ;;  %p2012_p5 = scmp.lt.s32.totalorder %s2010_s26, %s2004_s14 }
 0x195   : > { %v948_v34 = vld [vmem:[#allocation5 + $0x80] sm:$0xff] }
 0x196   : > { %v923_v32 = vrot.slane %v783_v33, %v2499_v55  ;;  %v1734_v33 = vpack.c.bf16 %v947_v31, %v946_v25  ;;  %p2006_p13 = pnand %p2005_p4, %p2772_p6  ;;  %p2013_p8 = por %p2012_p5, %p2011_p11 }
 0x198   : > { %v924_v35 = vadd.f32 %v923_v32, %v618_v6  ;;  %v962_v6 = vld [vmem:[#allocation7 + $0x78] sm:$0xff]  ;;  %v949_v32 = vld [vmem:[#allocation5 + $0x88] sm:$0xff]  ;;  %p2007_p10 = pneg %p2006_p13 }
 0x199   : > { %v1752_v7 = vpack.c.bf16 %v962_v6, %v961_v5 }
 0x19a   : > { %v925_v26 = vmax.f32 %v924_v35, 0.0  ;;  %v1737_v35 = vpack.c.bf16 %v949_v32, %v948_v34  ;;  %p2014_p12 = pnand %p2013_p8, %p2007_p10 }
 0x19b   : > { %1753 = vmatpush3.bf16.msra.mxu0 %v1752_v7 }
 0x19c   : > { %v2527_v36 = vadd.f32 %v925_v26, %v2475_v48  ;;  %1754 = vmatprep.subr.bf16.mxu0 %v2137_v0  ;;  %v950_v26 = vld [vmem:[#allocation5 + $0x90] sm:$0xff] }
 0x19e   : > { %v927_v37 = vsel %vm547_vm4, %v2527_v36, 0.0 }
 0x19f   : > { %928 = vadd.xlane.f32.xlu0 %v927_v37  ;;  %1756 = vmatpush3.bf16.msra.mxu0 %v1755_v10 }
 0x1a0   : > { %1757 = vmatprep.subr.bf16.mxu0 %v2137_v0 }
 0x1a3   : > { %1759 = vmatpush3.bf16.msra.mxu0 %v1758_v13 }
 0x1a4   : > { %1760 = vmatprep.subr.bf16.mxu0 %v2137_v0 }
 0x1a7   : > { %1762 = vmatpush3.bf16.msra.mxu0 %v1761_v16 }
 0x1a8   : > { %1763 = vmatprep.subr.bf16.mxu0 %v2137_v0 }
 0x219   : > { %v845_v39 = vpop.xlane.xlu0 %844 }
 0x21a   : > { %v856_v40 = vmul.f32 0.010416667, %v845_v39  ;;  %v953_v39 = vld [vmem:[#allocation5 + $0xa8] sm:$0xff] }
 0x21b   : > { %v851_v41 = vpop.xlane.xlu1 %850 }
 0x21c   : > { %v2531_v42 = vsub.f32 %v839_v18, %v856_v40  ;;  %v858_v43 = vmul.f32 0.010416667, %v851_v41  ;;  %v970_v18 = vld [vmem:[#allocation7 + $0xb8] sm:$0xff]  ;;  %v1743_v40 = vpack.c.bf16 %v953_v39, %v952_v38  ;;  %v954_v41 = vld [vmem:[#allocation5 + $0xb0] sm:$0xff] }
 0x21d   : > { %v848_v44 = vpop.xlane.xlu0 %847  ;;  %v1764_v19 = vpack.c.bf16 %v970_v18, %v969_v17  ;;  %v1465_v39 = vld [vmem:[%s2717_s5 + $0x1] ss:$0 sm:$0xff] }
 0x21e   : > { %v2533_v45 = vsub.f32 %v841_v23, %v858_v43  ;;  %v857_v46 = vmul.f32 0.010416667, %v848_v44  ;;  %v864_v47 = vmul.f32 %v2531_v42, %v2531_v42  ;;  %v955_v43 = vld [vmem:[#allocation5 + $0xb8] sm:$0xff] }
 0x21f   : > { %v854_v48 = vpop.xlane.xlu1 %853  ;;  %1765 = vmatpush3.bf16.msra.mxu0 %v1764_v19  ;;  %v1746_v44 = vpack.c.bf16 %v955_v43, %v954_v41 }
 0x220   : > { %v2537_v49 = vsub.f32 %v840_v24, %v857_v46  ;;  %v859_v50 = vmul.f32 0.010416667, %v854_v48  ;;  %v868_v51 = vsel %vm547_vm4, %v864_v47, 0.0  ;;  %v866_v52 = vmul.f32 %v2533_v45, %v2533_v45 }
 0x221   : > { %869 = vadd.xlane.f32.xlu1 %v868_v51 }
 0x222   : > { %v2542_v53 = vsub.f32 %v842_v29, %v859_v50  ;;  %v865_v54 = vmul.f32 %v2537_v49, %v2537_v49  ;;  %v874_v57 = vsel %vm547_vm4, %v866_v52, 0.0  ;;  %v1731_v29 = vpack.c.bf16 %v945_v28, %v944_v27 }
 0x224   : > { %v871_v56 = vsel %vm547_vm4, %v865_v54, 0.0  ;;  %v867_v58 = vmul.f32 %v2542_v53, %v2542_v53  ;;  %1732 = vmatpush3.bf16.msra.mxu1 %v1731_v29 }
 0x225   : > { %872 = vadd.xlane.f32.xlu0 %v871_v56  ;;  %875 = vadd.xlane.f32.xlu1 %v874_v57 }
 0x226   : > { %v877_v60 = vsel %vm547_vm4, %v867_v58, 0.0  ;;  %1733 = vmatprep.subr.bf16.mxu1 %v2137_v0 }
 0x228   : > { %1735 = vmatpush3.bf16.msra.mxu1 %v1734_v33 }
 0x229   : > { %878 = vadd.xlane.f32.xlu0 %v877_v60  ;;  %1736 = vmatprep.subr.bf16.mxu1 %v2137_v0 }
 0x22c   : > { %v929_v20 = vpop.xlane.xlu0 %928  ;;  %1738 = vmatpush3.bf16.msra.mxu1 %v1737_v35 }
 0x22d   : > { %v930_v21 = vmul.f32 0.010416667, %v929_v20  ;;  %1739 = vmatprep.subr.bf16.mxu1 %v2137_v0 }
 0x22f   : > { %v2561_v22 = vsub.f32 %v2527_v36, %v930_v21  ;;  %v951_v36 = vld [vmem:[#allocation5 + $0x98] sm:$0xff] }
 0x230   : > { %v1740_v37 = vpack.c.bf16 %v951_v36, %v950_v26 }
 0x231   : > { %v932_v23 = vmul.f32 %v2561_v22, %v2561_v22 }
 0x232   : > { %1741 = vmatpush3.bf16.msra.mxu1 %v1740_v37 }
 0x233   : > { %v933_v24 = vsel %vm547_vm4, %v932_v23, 0.0  ;;  %1742 = vmatprep.subr.bf16.mxu1 %v2137_v0 }
 0x236   : > { %494 = vperm.xlu1 %1899, %v484_v61   ;;  %1744 = vmatpush3.bf16.msra.mxu1 %v1743_v40 }
 0x237   : > { %1745 = vmatprep.subr.bf16.mxu1 %v2137_v0 }
 0x23a   : > { %499 = vperm.xlu1 %1899, %v485_v62   ;;  %1747 = vmatpush3.bf16.msra.mxu1 %v1746_v44  ;;  %v1457_v62 = vld [vmem:[%s2767_s10] ss:$0 sm:$0xff] }
 0x23e   : > { %504 = vperm.xlu1 %1899, %v486_v3  }
 0x23f   : > { %489 = vperm.xlu0 %1898, %v483_v4  }
 0x262   : > { %934 = vadd.xlane.f32.xlu1 %v933_v24 }
 0x273   : > { %510 = vperm.xlu1 %1899, %v507_v30  }
 0x2ae   : > { %v870_v46 = vpop.xlane.xlu1 %869 }
 0x2af   : > { %v880_v47 = vmul.f32 0.010416667, %v870_v46 }
 0x2b1   : > { %v884_v48 = vadd.f32 1e-12, %v880_v47 }
 0x2b2   : > { %v873_v50 = vpop.xlane.xlu0 %872  ;;  %v876_v51 = vpop.xlane.xlu1 %875 }
 0x2b3   : > { %1900 = vrsqrt.f32 %v884_v48  ;;  %v881_v52 = vmul.f32 0.010416667, %v873_v50  ;;  %v882_v54 = vmul.f32 0.010416667, %v876_v51  ;;  %v1463_v48 = vld [vmem:[%s2715_s3 + $0x1] ss:$0 sm:$0xff] }
 0x2b5   : > { %v885_v56 = vadd.f32 1e-12, %v881_v52  ;;  %v886_v57 = vadd.f32 1e-12, %v882_v54 }
 0x2b6   : > { %v879_v58 = vpop.xlane.xlu0 %878  ;;  %v2581_v2 = vpop.permute.xlu1 %494 }
 0x2b7   : > { %1902 = vrsqrt.f32 %v885_v56  ;;  %v883_v60 = vmul.f32 0.010416667, %v879_v58 }
 0x2b8   : > { %1904 = vrsqrt.f32 %v886_v57 }
 0x2b9   : > { %v887_v61 = vadd.f32 1e-12, %v883_v60 }
 0x2bb   : > { %1906 = vrsqrt.f32 %v887_v61 }
 0x2bd   : > { %v1901_v0 = vpop.eup %1900 }
 0x2be   : > { %v892_v63 = vmul.f32 %v1901_v0, %v2531_v42  ;;  %v2585_v9 = vpop.permute.xlu0 %489  ;;  %v2587_v42 = vpop.permute.xlu1 %499 }
 0x2c0   : > { %v902_v3 = vmul.f32 %v1457_v62, %v892_v63 }
 0x2c1   : > { %v1903_v4 = vpop.eup %1902 }
 0x2c2   : > { %v1905_v5 = vpop.eup %1904  ;;  %v893_v6 = vmul.f32 %v1903_v4, %v2537_v49  ;;  %v912_v7 = vadd.f32 %v1458_v1, %v902_v3  ;;  %v2593_v23 = vpop.permute.xlu1 %504 }
 0x2c3   : > { %v894_v8 = vmul.f32 %v1905_v5, %v2533_v45 }
 0x2c4   : > { %v903_v10 = vmul.f32 %v1457_v62, %v893_v6  ;;  %v916_v15 = vmul.f32 %v912_v7, %v2585_v9 }
 0x2c5   : > { %v1907_v11 = vpop.eup %1906  ;;  %v904_v12 = vmul.f32 %v1457_v62, %v894_v8 }
 0x2c6   : > { %v913_v13 = vadd.f32 %v1458_v1, %v903_v10  ;;  %v895_v14 = vmul.f32 %v1907_v11, %v2542_v53  ;;  %v1066_v20 = vrot.slane %v916_v15, 7 }
 0x2c7   : > { %v914_v16 = vadd.f32 %v1458_v1, %v904_v12 }
 0x2c8   : > { %v917_v17 = vmul.f32 %v913_v13, %v2581_v2  ;;  %v905_v18 = vmul.f32 %v1457_v62, %v895_v14 }
 0x2c9   : > { %v918_v49 = vmul.f32 %v914_v16, %v2587_v42 }
 0x2ca   : > { %v1067_v19 = vrot.slane %v917_v17, 6  ;;  %v915_v45 = vadd.f32 %v1458_v1, %v905_v18 }
 0x2cb   : > { %v1069_v21 = vrot.slane %v918_v49, 5 }
 0x2cc   : > { %v919_v24 = vmul.f32 %v915_v45, %v2593_v23  ;;  %v1068_v27 = vsel %vm633_vm1, %v1067_v19, %v1066_v20 }
 0x2cd   : > { %v1070_v53 = vsel %vm636_vm2, %v1069_v21, %v1068_v27 }
 0x2ce   : > { %v1071_v28 = vrot.slane %v919_v24, 4 }
 0x2d0   : > { %v1072_v29 = vsel %vm639_vm3, %v1071_v28, %v1070_v53 }
 0x2d1   : > { %1674 = vmatmul.mubr.msk.f32.vlgmr.msra.gmra.mrb[4].mxu0 %vm547_vm4, %v1072_v29 }
 0x2ef   : > { %v935_v30 = vpop.xlane.xlu1 %934 }
 0x2f0   : > { %v936_v25 = vmul.f32 0.010416667, %v935_v30 }
 0x2f2   : > { %v937_v31 = vadd.f32 1e-12, %v936_v25 }
 0x2f3   : > { %v511_v26 = vpop.permute.xlu1 %510 }
 0x2f4   : > { %1908 = vrsqrt.f32 %v937_v31 }
 0x2fe   : > { %v1909_v33 = vpop.eup %1908 }
 0x2ff   : > { %v939_v34 = vmul.f32 %v1909_v33, %v2561_v22 }
 0x301   : > { %v940_v32 = vmul.f32 %v1457_v62, %v939_v34 }
 0x303   : > { %v941_v35 = vadd.f32 %v1458_v1, %v940_v32 }
 0x305   : > { %v942_v36 = vmul.f32 %v941_v35, %v511_v26 }
 0x307   : > { %1647 = vmatmul.mubr.msk.f32.vlgmr.msra.gmra.mrb[2].mxu1 %vm547_vm4, %v942_v36 }
 0x3a4   : > { %v1141_v37 = vpop.f32.mrb[4].mxu0 }
 0x3a5   : > { %v1675_v38 = vpop.f32.mrb[5].mxu0  ;;  %v1142_v40 = vadd.f32 %v1465_v39, %v1141_v37 }
 0x3a7   : > { %v1152_v41 = vrot.slane %v1142_v40, %v2505_v59 }
 0x3a9   : > { %v1153_v43 = vcombine.high %v1152_v41, %v1152_v41  ;;  %v1160_v44 = vrot.slane %v1152_v41, %v2505_v59 }
 0x3ab   : > { %v1167_v22 = vrot.slane %v1153_v43, %v2505_v59  ;;  %v1168_v46 = vcombine.high %v1160_v44, %v1160_v44  ;;  %v1173_v50 = vrot.slane %v1160_v44, %v2499_v55 }
 0x3ad   : > { %v1169_v47 = vcombine.high %v1167_v22, %v1167_v22  ;;  %v1177_v56 = vrot.slane %v1167_v22, %v2499_v55  ;;  %v1181_v57 = vrot.slane %v1168_v46, %v2499_v55  ;;  %v1467_v22 = vld [vmem:[%s2767_s10 + $0x1] ss:$0 sm:$0xff] }
 0x3af   : > { %v1185_v58 = vrot.slane %v1169_v47, %v2499_v55 }
 0x3da   : > { %v1052_v51 = vpop.f32.mrb[2].mxu1 }
 0x3db   : > { %v1053_v52 = vadd.f32 %v1463_v48, %v1052_v51  ;;  %v1648_v54 = vpop.f32.mrb[3].mxu1  ;;  %v1468_v48 = vld [vmem:[%s2768_s29 + $0x1] ss:$0 sm:$0xff] }
 0x3dd   : > { %v1191_v60 = vadd.f32 %v1177_v56, %v1053_v52  ;;  %v1190_v61 = vadd.f32 %v1173_v50, %v1053_v52  ;;  %v1192_v59 = vadd.f32 %v1181_v57, %v1053_v52  ;;  %v1193_v0 = vadd.f32 %v1185_v58, %v1053_v52 }
 0x3df   : > { %v1195_v62 = vmax.f32 %v1191_v60, 0.0  ;;  %v1194_v63 = vmax.f32 %v1190_v61, 0.0  ;;  %v1196_v1 = vmax.f32 %v1192_v59, 0.0  ;;  %v1197_v8 = vmax.f32 %v1193_v0, 0.0 }
 0x3e1   : > { %v1199_v3 = vadd.f32 %v1195_v62, %v917_v17  ;;  %v1198_v4 = vadd.f32 %v1194_v63, %v916_v15  ;;  %v1200_v7 = vadd.f32 %v1196_v1, %v918_v49  ;;  %v1201_v55 = vadd.f32 %v1197_v8, %v919_v24 }
 0x3e3   : > { %v1205_v5 = vsel %vm547_vm4, %v1199_v3, 0.0  ;;  %v1202_v6 = vsel %vm547_vm4, %v1198_v4, 0.0  ;;  %v1208_v10 = vsel %vm547_vm4, %v1200_v7, 0.0  ;;  %v1211_v11 = vsel %vm547_vm4, %v1201_v55, 0.0 }
 0x3e4   : > { %1206 = vadd.xlane.f32.xlu0 %v1205_v5  ;;  %1203 = vadd.xlane.f32.xlu1 %v1202_v6 }
 0x3e8   : > { %1209 = vadd.xlane.f32.xlu1 %v1208_v10 }
 0x3ec   : > { %1212 = vadd.xlane.f32.xlu1 %v1211_v11 }
 0x471   : > { %v1207_v12 = vpop.xlane.xlu0 %1206  ;;  %v1204_v13 = vpop.xlane.xlu1 %1203 }
 0x472   : > { %v1215_v14 = vmul.f32 0.010416667, %v1207_v12  ;;  %v1214_v16 = vmul.f32 0.010416667, %v1204_v13 }
 0x474   : > { %v1219_v15 = vsub.f32 %v1199_v3, %v1215_v14  ;;  %v1218_v17 = vsub.f32 %v1198_v4, %v1214_v16 }
 0x475   : > { %v1210_v18 = vpop.xlane.xlu1 %1209 }
 0x476   : > { %v1216_v19 = vmul.f32 0.010416667, %v1210_v18  ;;  %v1223_v45 = vmul.f32 %v1219_v15, %v1219_v15  ;;  %v1222_v49 = vmul.f32 %v1218_v17, %v1218_v17 }
 0x478   : > { %v1220_v20 = vsub.f32 %v1200_v7, %v1216_v19  ;;  %v1229_v21 = vsel %vm547_vm4, %v1223_v45, 0.0  ;;  %v1226_v27 = vsel %vm547_vm4, %v1222_v49, 0.0 }
 0x479   : > { %1230 = vadd.xlane.f32.xlu0 %v1229_v21  ;;  %1227 = vadd.xlane.f32.xlu1 %v1226_v27  ;;  %v1213_v24 = vpop.xlane.xlu1 %1212 }
 0x47a   : > { %v1217_v28 = vmul.f32 0.010416667, %v1213_v24  ;;  %v1224_v53 = vmul.f32 %v1220_v20, %v1220_v20 }
 0x47c   : > { %v1221_v29 = vsub.f32 %v1201_v55, %v1217_v28  ;;  %v1232_v30 = vsel %vm547_vm4, %v1224_v53, 0.0 }
 0x47d   : > { %1233 = vadd.xlane.f32.xlu1 %v1232_v30 }
 0x47e   : > { %v1225_v25 = vmul.f32 %v1221_v29, %v1221_v29 }
 0x480   : > { %v1235_v31 = vsel %vm547_vm4, %v1225_v25, 0.0 }
 0x481   : > { %1236 = vadd.xlane.f32.xlu0 %v1235_v31 }
 0x506   : > { %v1231_v33 = vpop.xlane.xlu0 %1230  ;;  %v1228_v34 = vpop.xlane.xlu1 %1227 }
 0x507   : > { %v1239_v32 = vmul.f32 0.010416667, %v1231_v33  ;;  %v1238_v35 = vmul.f32 0.010416667, %v1228_v34 }
 0x509   : > { %v1243_v26 = vadd.f32 1e-12, %v1239_v32  ;;  %v1242_v36 = vadd.f32 1e-12, %v1238_v35 }
 0x50a   : > { %v1234_v37 = vpop.xlane.xlu1 %1233 }
 0x50b   : > { %1910 = vrsqrt.f32 %v1243_v26  ;;  %v1240_v38 = vmul.f32 0.010416667, %v1234_v37 }
 0x50c   : > { %1912 = vrsqrt.f32 %v1242_v36 }
 0x50d   : > { %v1244_v39 = vadd.f32 1e-12, %v1240_v38 }
 0x50e   : > { %v1237_v40 = vpop.xlane.xlu0 %1236 }
 0x50f   : > { %1914 = vrsqrt.f32 %v1244_v39  ;;  %v1241_v41 = vmul.f32 0.010416667, %v1237_v40 }
 0x511   : > { %v1245_v43 = vadd.f32 1e-12, %v1241_v41 }
 0x513   : > { %1916 = vrsqrt.f32 %v1245_v43 }
 0x515   : > { %v1911_v44 = vpop.eup %1910 }
 0x516   : > { %v1913_v46 = vpop.eup %1912  ;;  %v1251_v47 = vmul.f32 %v1911_v44, %v1219_v15 }
 0x517   : > { %v1250_v50 = vmul.f32 %v1913_v46, %v1218_v17 }
 0x518   : > { %v1261_v51 = vmul.f32 %v1467_v22, %v1251_v47 }
 0x519   : > { %v1915_v52 = vpop.eup %1914  ;;  %v1260_v54 = vmul.f32 %v1467_v22, %v1250_v50 }
 0x51a   : > { %v1271_v56 = vadd.f32 %v1468_v48, %v1261_v51  ;;  %v1252_v57 = vmul.f32 %v1915_v52, %v1220_v20 }
 0x51b   : > { %v1270_v58 = vadd.f32 %v1468_v48, %v1260_v54 }
 0x51c   : > { %v1275_v60 = vmul.f32 %v1271_v56, %v2581_v2  ;;  %v1262_v61 = vmul.f32 %v1467_v22, %v1252_v57 }
 0x51d   : > { %v1917_v59 = vpop.eup %1916  ;;  %v1274_v0 = vmul.f32 %v1270_v58, %v2585_v9 }
 0x51e   : > { %v1272_v62 = vadd.f32 %v1468_v48, %v1262_v61  ;;  %v1253_v63 = vmul.f32 %v1917_v59, %v1221_v29  ;;  %1279 = vst.msk [vmem:[%s460_s7 + $0x8] sm:$0xff] %vm547_vm4, %v1275_v60 }
 0x51f   : > { %1278 = vst.msk [vmem:[%s460_s7] sm:$0xff] %vm547_vm4, %v1274_v0 }
 0x520   : > { %v1276_v1 = vmul.f32 %v1272_v62, %v2587_v42  ;;  %v1263_v3 = vmul.f32 %v1467_v22, %v1253_v63 }
 0x522   : > { %v1273_v2 = vadd.f32 %v1468_v48, %v1263_v3  ;;  %1280 = vst.msk [vmem:[%s460_s7 + $0x10] sm:$0xff] %vm547_vm4, %v1276_v1 }
 0x524   : > { %v1277_v9 = vmul.f32 %v1273_v2, %v2593_v23 }
 0x526   : > { %1281 = vst.msk [vmem:[%s460_s7 + $0x18] sm:$0xff] %vm547_vm4, %v1277_v9 }
 0x527   : > { %2017 = shalt.err (!%p2014_p12)
}
 0x528   : > { %s2018_s2 = scalar_lea.hbm %s2642_s8, 512  ;;  %s2022_s30 = scalar_lea.hbm %s2771_s24, 2048 }
 0x529   : > { %p2019_p2 = scmp.ne.s32.totalorder %s2642_s8, %s2018_s2  ;;  %p2023_p0 = scmp.lt.u32.totalorder %s2642_s8, %s2771_s24 }
 0x52a   : > { %p2024_p3 = scmp.lt.u32.totalorder %s2022_s30, %s2018_s2  ;;  %p2026_p4 = scmp.lt.u32.totalorder %s2018_s2, %s2642_s8 }
 0x52b   : > { %p2020_p9 = pnand %p2019_p2, %p2772_p6 }
 0x52c   : > { %p2025_p1 = por %p2024_p3, %p2023_p0 }
 0x52d   : > { %p2021_p7 = pneg %p2020_p9 }
 0x52e   : > { %p2027_p13 = por %p2026_p4, %p2025_p1 }
 0x530   : > { %p2028_p10 = pnand %p2027_p13, %p2021_p7 }
 0x532   : > { %2031 = shalt.err (!%p2028_p10)
}
 0x533   : > { %s2143_s4 = smov 128   ;;  %s2144_s11 = smov 8  }
 0x534   : > { %1776 = dma.vmem_to_hbm [thread:$0]  (%p2772_p6), %s2645_s20, 512, %s2642_s8, %s2651_s9, %s2143_s4, %s2143_s4, %s2144_s11  }
 0x535 PF: > { %s2773_s14 = sld [smem:[#allocation12_spill]]  ;;  %s2774_s21 = sld [smem:[#allocation16_spill]] }
 0x536   : > { %p1798_p11 = scmp.ge.s32.totalorder %s2130_s23, 2 }
 0x53b   : > { %s1313_s19 = sand.u32 1, %s2773_s14   ;;  %p2775_p5 = scmp.ne.s32.totalorder %s2774_s21, 0 }
 0x53c   : > { %s1314_s26 = scalar_lea.sflag [#allocation4], %s1313_s19 }
 0x53d   : > { %p1790_p8 = pnand %p1798_p11, %p2775_p5 }
 0x53f   : > { %2085 = dma.done.wait (!%p1790_p8), %s1314_s26, 512  }
 0x540   : > { %2087 = vsyncadd (!%p1790_p8), %s1314_s26, 4294966784  ;;  %s27_s23 = sadd.s32 1, %s2130_s23   ;;  %s2776_s13 = sld [smem:[#allocation13_spill]] }
 0x541   : > { %p24_p12 = scmp.ge.s32.totalorder %s27_s23, 6   ;;  %s2777_s19 = sld [smem:[#allocation14_spill]] }
 0x542   : > { %s2778_s21 = sld [smem:[#allocation17_spill]]  ;;  %s2779_s28 = smov %s2792_s16 }
 0x543   : > { %s2780_s14 = smov %s2098_s15  ;;  %s2781_s15 = smov %s2368_s6 }
 0x544   : > { %s2782_s16 = smov %s2106_s17  ;;  %s2783_s17 = smov %s2110_s18 }
 0x545   : > { %s2784_s18 = smov %s2365_s12  ;;  %s2785_s20 = smov %s2126_s22 }
 0x546   : > { %s2786_s22 = smov %s2779_s28  ;;  %26 = sbr.rel (!%p24_p12) target bundleno = 18 (0x12), region = 125 }
 0x54d   :  { %1319 = vsyncpa [#allocation3], 1 }
 0x54e   :  { %1321 = vsyncpa [#allocation3 + $0x1], 1 }
 0x54f   :  { %1322 = vsyncpa [#allocation6], 1 }
 0x550   :  { %1323 = vsyncpa [#allocation4], 1 }
 0x551   :  { %1325 = vsyncpa [#allocation4 + $0x1], 1 }

</bundles_post_ra>
